<compile_context>
chip_gen: v7x
topology: tpu7x:2x2x1
jax: 0.10.0
libtpu: 0.0.40
codegen_flags: <defaults>
</compile_context>

<pallas_src>
import jax
import jax.numpy as jnp
from jax.experimental import pallas as pl
from jax.experimental.pallas import tpu as pltpu


def _fused_multihead_linear_kernel(x_ref, w_ref, b_ref, o_ref):
    # x_ref: (B, D_in)      bf16 — shared input
    # w_ref: (D_in, H*D_out) bf16 — all heads' weights, concatenated along columns
    # b_ref: (1, H*D_out)    f32  — all heads' biases
    # o_ref: (B, H*D_out)    f32  — concatenated output
    acc = jnp.dot(x_ref[...], w_ref[...], preferred_element_type=jnp.float32)
    o_ref[...] = (acc + b_ref[...]).astype(o_ref.dtype)


def multi_net_forward(x, W, b):
    """x: (B, D_in) f32; W: (H, D_in, D_out); b: (H, D_out) -> (B, H*D_out) f32."""
    B, D_in = x.shape
    H, _, D_out = W.shape
    N = H * D_out

    # Express the concatenation in the weight layout instead of the output
    # index_map: head h occupies output columns [h*D_out, (h+1)*D_out).
    W_fused = jnp.transpose(W, (1, 0, 2)).reshape(D_in, N)
    b_fused = b.reshape(1, N)

    # bf16 MXU operands, f32 accumulation / bias / output.
    x_bf = x.astype(jnp.bfloat16)
    W_bf = W_fused.astype(jnp.bfloat16)

    return pl.pallas_call(
        _fused_multihead_linear_kernel,
        out_shape=jax.ShapeDtypeStruct((B, N), x.dtype),
        grid_spec=pltpu.PrefetchScalarGridSpec(
            num_scalar_prefetch=0,
            grid=(1,),  # single fused step — concat is free in the weight layout
            in_specs=[
                pl.BlockSpec((B, D_in), lambda i: (0, 0)),
                pl.BlockSpec((D_in, N), lambda i: (0, 0)),
                pl.BlockSpec((1, N), lambda i: (0, 0)),
            ],
            out_specs=pl.BlockSpec((B, N), lambda i: (0, 0)),
        ),
        compiler_params=pltpu.CompilerParams(
            dimension_semantics=("arbitrary",),
        ),
    )(x_bf, W_bf, b_fused)


if __name__ == "__main__":
    # Small shapes consistent with the module; aligned to (8, 128) TPU tiles.
    HEADS = 4
    B, D_IN, D_OUT = 8, 128, 128

    key = jax.random.PRNGKey(0)
    kx, kw, kb = jax.random.split(key, 3)

    x = jax.random.normal(kx, (B, D_IN), dtype=jnp.float32)
    # Deterministic per-head parameters (synthetic, nn.Linear-shaped).
    W = jax.random.normal(kw, (HEADS, D_IN, D_OUT), dtype=jnp.float32) * 0.02
    b = jax.random.normal(kb, (HEADS, D_OUT), dtype=jnp.float32) * 0.1

    out = multi_net_forward(x, W, b)
    out = jax.block_until_ready(out)
    assert out.shape == (B, HEADS * D_OUT), out.shape

    # Reference 1: same semantics with the same bf16 operand precision.
    x_bf = x.astype(jnp.bfloat16)
    ref_bf16 = jnp.concatenate(
        [
            jnp.dot(x_bf, W[h].astype(jnp.bfloat16),
                    preferred_element_type=jnp.float32) + b[h]
            for h in range(HEADS)
        ],
        axis=-1,
    )
    assert jnp.allclose(out, ref_bf16, atol=1e-3, rtol=1e-3), \
        "mismatch vs bf16-operand reference"

    # Reference 2: full-f32 module semantics (looser tolerance covers bf16 cast).
    ref_f32 = jnp.concatenate([x @ W[h] + b[h] for h in range(HEADS)], axis=-1)
    assert jnp.allclose(out, ref_f32, atol=1e-2, rtol=1e-2), \
        "mismatch vs f32 reference"

    print("KERNEL_OK")
</pallas_src>

<mosaic_0001>
module attributes {stable_mosaic.version = 11 : i64} {
  func.func @_fused_multihead_linear_kernel(%arg0: i32, %arg1: memref<8x128xbf16, #tpu.memory_space<vmem>>, %arg2: memref<128x512xbf16, #tpu.memory_space<vmem>>, %arg3: memref<1x512xf32, #tpu.memory_space<vmem>>, %arg4: memref<8x512xf32, #tpu.memory_space<vmem>>) attributes {dimension_semantics = [#tpu.dimension_semantics<arbitrary>], iteration_bounds = array<i64: 1>, scalar_prefetch = 0 : i64, scratch_operands = 0 : i64, tpu.core_type = #tpu.core_type<tc>, window_params = [{pipeline_mode = #tpu.pipeline_mode<synchronous>, transform_indices = @transform_0, window_bounds = array<i64: 8, 128>}, {pipeline_mode = #tpu.pipeline_mode<synchronous>, transform_indices = @transform_1, window_bounds = array<i64: 128, 512>}, {pipeline_mode = #tpu.pipeline_mode<synchronous>, transform_indices = @transform_2, window_bounds = array<i64: 1, 512>}, {pipeline_mode = #tpu.pipeline_mode<synchronous>, transform_indices = @transform_3, window_bounds = array<i64: 8, 512>}]} {
    %c0 = arith.constant 0 : index
    %c0_0 = arith.constant 0 : index
    %0 = vector.load %arg1[%c0, %c0_0] : memref<8x128xbf16, #tpu.memory_space<vmem>>, vector<8x128xbf16>
    %c0_1 = arith.constant 0 : index
    %c0_2 = arith.constant 0 : index
    %1 = vector.load %arg2[%c0_1, %c0_2] : memref<128x512xbf16, #tpu.memory_space<vmem>>, vector<128x512xbf16>
    %cst = arith.constant dense<0.000000e+00> : vector<8x512xf32>
    %2 = tpu.matmul %0, %1, %cst {dimension_numbers = #tpu.dot_dimension_numbers<[1], [0], [0], [1], [0, 0, 1, 1], [], []>} : vector<8x128xbf16>, vector<128x512xbf16>, vector<8x512xf32> -> vector<8x512xf32>
    %c0_3 = arith.constant 0 : index
    %c0_4 = arith.constant 0 : index
    %3 = vector.load %arg3[%c0_3, %c0_4] : memref<1x512xf32, #tpu.memory_space<vmem>>, vector<1x512xf32>
    %4 = vector.broadcast %3 : vector<1x512xf32> to vector<8x512xf32>
    %5 = arith.addf %2, %4 : vector<8x512xf32>
    %c0_5 = arith.constant 0 : index
    %c0_6 = arith.constant 0 : index
    %6 = vector.load %arg4[%c0_5, %c0_6] : memref<8x512xf32, #tpu.memory_space<vmem>>, vector<8x512xf32>
    tpu.vector_store %arg4[%c0_5, %c0_6], %5 {strides = array<i32>} : memref<8x512xf32, #tpu.memory_space<vmem>>, vector<8x512xf32>,
    return
  }
  func.func @transform_0(%arg0: i32) -> (i32, i32) {
    %c0_i32 = arith.constant 0 : i32
    %c0_i32_0 = arith.constant 0 : i32
    %c0_i32_1 = arith.constant 0 : i32
    return %c0_i32, %c0_i32_0 : i32, i32
  }
  func.func @transform_1(%arg0: i32) -> (i32, i32) {
    %c0_i32 = arith.constant 0 : i32
    %c0_i32_0 = arith.constant 0 : i32
    %c0_i32_1 = arith.constant 0 : i32
    return %c0_i32, %c0_i32_0 : i32, i32
  }
  func.func @transform_2(%arg0: i32) -> (i32, i32) {
    %c0_i32 = arith.constant 0 : i32
    %c0_i32_0 = arith.constant 0 : i32
    %c0_i32_1 = arith.constant 0 : i32
    return %c0_i32, %c0_i32_0 : i32, i32
  }
  func.func @transform_3(%arg0: i32) -> (i32, i32) {
    %c0_i32 = arith.constant 0 : i32
    %c0_i32_0 = arith.constant 0 : i32
    %c0_i32_1 = arith.constant 0 : i32
    return %c0_i32, %c0_i32_0 : i32, i32
  }
}

</mosaic_0001>

<bundles_post_ra>
// kernel: tpu_custom_call.1
= control target key start
LH: loop header
LB: loop body
LE: loop exit
PB: predicated region body
PF: predicated region fallthrough
CT: control target
= control target key end

     0   :  { %8 = vsyncpa [#allocation3], 0  ;;  %s589_s0 = inlined_call_operand.hbm [shape: bf16[8,128], index: 0, kind: input, shape index: {}]   ;;  %s590_s1 = inlined_call_operand.hbm [shape: bf16[128,512], index: 1, kind: input, shape index: {}]   ;;  %s591_s2 = inlined_call_operand.vmem [shape: f32[1,512], index: 2, kind: input, shape index: {}]   ;;  %s592_s3 = inlined_call_operand.hbm [shape: f32[8,512], index: 3, kind: output, shape index: {}]  }
   0x1   :  { %9 = vsyncpa [#allocation6], 0 }
   0x2   :  { %10 = vsyncpa [#allocation4], 0  ;;  %s517_s12 = smov [#allocation2]   ;;  %s518_s14 = smov [#allocation5]  }
   0x3   :  { %s17_s13 = sshll.u32 %s517_s12, 4  ;;  %s26_s15 = sshll.u32 %s518_s14, 4  ;;  %s18_s13 = int_to_ptr.vmem [resolvable:$true] %s17_s13  ;;  %s543_s15 = int_to_ptr.vmem [resolvable:$true] %s26_s15 }
   0x4   :  { %s445_s18 = scalar_lea.hbm %s589_s0, 64 }
   0x5   :  { %p446_p0 = scmp.ne.s32.totalorder %s589_s0, %s445_s18  ;;  %p449_p1 = scmp.lt.u32.totalorder %s445_s18, %s589_s0 }
   0x7   :  { %p451_p2 = pnand %p449_p1, %p446_p0 }
   0x9   :  { %454 = shalt.err (!%p451_p2)
}
   0xa   :  { %s455_s23 = scalar_lea.vmem %s18_s13, 64  ;;  %p460_p4 = scmp.lt.s32.totalorder %s18_s13, %s18_s13 }
   0xb   :  { %p456_p3 = scmp.ne.s32.totalorder %s18_s13, %s455_s23  ;;  %p461_p5 = scmp.lt.s32.totalorder %s455_s23, %s455_s23 }
   0xd   :  { %p462_p6 = por %p461_p5, %p460_p4 }
   0xf   :  { %p463_p7 = pnand %p462_p6, %p456_p3 }
  0x11   :  { %466 = shalt.err (!%p463_p7)
}
  0x12   :  { %20 = dma.hbm_to_vmem [thread:$0]  %s589_s0, 64, %s18_s13, [#allocation3]  }
  0x13   :  { %s467_s28 = scalar_lea.hbm %s590_s1, 4096 }
  0x14   :  { %p468_p8 = scmp.ne.s32.totalorder %s590_s1, %s467_s28  ;;  %p471_p9 = scmp.lt.u32.totalorder %s467_s28, %s590_s1 }
  0x16   :  { %p473_p10 = pnand %p471_p9, %p468_p8 }
  0x18   :  { %476 = shalt.err (!%p473_p10)
}
  0x19   :  { %s477_s6 = scalar_lea.vmem %s543_s15, 4096  ;;  %p482_p12 = scmp.lt.s32.totalorder %s543_s15, %s543_s15 }
  0x1a   :  { %p478_p11 = scmp.ne.s32.totalorder %s543_s15, %s477_s6  ;;  %p483_p13 = scmp.lt.s32.totalorder %s477_s6, %s477_s6 }
  0x1c   :  { %p484_p0 = por %p483_p13, %p482_p12 }
  0x1e   :  { %p485_p1 = pnand %p484_p0, %p478_p11 }
  0x20   :  { %488 = shalt.err (!%p485_p1)
}
  0x21   :  { %s519_s0 = smov 256   ;;  %s520_s7 = smov 16  }
  0x22   :  { %32 = dma.hbm_to_vmem [thread:$0]  %s590_s1, 4096, %s543_s15, [#allocation6], %s519_s0, %s519_s0, %s520_s7  }
  0x23   :  { %511 = dma.done.wait [#allocation3], 64  }
  0x24   :  { %512 = vsyncadd [#allocation3], 4294967232 }
  0x25   :  { %513 = dma.done.wait [#allocation6], 4096  }
  0x26   :  { %514 = vsyncadd [#allocation6], 4294963200  ;;  %v521_v0 = vmov 0   ;;  %v397_v1 = vld [vmem:[#allocation5 + $0x4] ss:$16 sps:$4 sm:$0xff]   ;;  %v77_v34 = vlaneseq  ;;  %s522_s11 = smov [#allocation7]  }
  0x27   :  { %289 = vmatprep.mubr.bf16.mxu0 %v521_v0  ;;  %330 = vmatprep.mubr.bf16.mxu1 %v521_v0  ;;  %v399_v2 = vld [vmem:[#allocation5 + $0xc] ss:$16 sps:$4 sm:$0xff]   ;;  %v401_v3 = vld [vmem:[#allocation5] ss:$16 sps:$4 sm:$0xff]   ;;  %v402_v4 = vld [vmem:[#allocation5 + $0x8] ss:$16 sps:$4 sm:$0xff]  }
  0x28   :  { %257 = vmatprep.subr.bf16.mxu0 %v397_v1  ;;  %298 = vmatprep.subr.bf16.mxu1 %v399_v2  ;;  %v403_v5 = vld [vmem:[#allocation5 + $0x24] ss:$16 sps:$4 sm:$0xff]   ;;  %v405_v6 = vld [vmem:[#allocation5 + $0x2c] ss:$16 sps:$4 sm:$0xff]   ;;  %v407_v7 = vld [vmem:[#allocation5 + $0x20] ss:$16 sps:$4 sm:$0xff]  }
  0x29   :  { %258 = vmatpush1.bf16.msra.mxu0 %v401_v3  ;;  %299 = vmatpush1.bf16.msra.mxu1 %v402_v4  ;;  %v408_v8 = vld [vmem:[#allocation5 + $0x28] ss:$16 sps:$4 sm:$0xff]   ;;  %v409_v9 = vld [vmem:[#allocation5 + $0x44] ss:$16 sps:$4 sm:$0xff]   ;;  %v411_v10 = vld [vmem:[#allocation5 + $0x4c] ss:$16 sps:$4 sm:$0xff]  }
  0x2a   :  { %259 = vmatprep.subr.bf16.mxu0 %v403_v5  ;;  %300 = vmatprep.subr.bf16.mxu1 %v405_v6  ;;  %v413_v11 = vld [vmem:[#allocation5 + $0x40] ss:$16 sps:$4 sm:$0xff]   ;;  %v414_v12 = vld [vmem:[#allocation5 + $0x48] ss:$16 sps:$4 sm:$0xff]   ;;  %v415_v13 = vld [vmem:[#allocation5 + $0x64] ss:$16 sps:$4 sm:$0xff]  }
  0x2b   :  { %v417_v14 = vld [vmem:[#allocation5 + $0x6c] ss:$16 sps:$4 sm:$0xff]   ;;  %v419_v15 = vld [vmem:[#allocation5 + $0x60] ss:$16 sps:$4 sm:$0xff]   ;;  %v420_v16 = vld [vmem:[#allocation5 + $0x68] ss:$16 sps:$4 sm:$0xff]  }
  0x2c   :  { %v421_v17 = vld [vmem:[#allocation5 + $0x84] ss:$16 sps:$4 sm:$0xff]   ;;  %v423_v18 = vld [vmem:[#allocation5 + $0x8c] ss:$16 sps:$4 sm:$0xff]   ;;  %v425_v19 = vld [vmem:[#allocation5 + $0x80] ss:$16 sps:$4 sm:$0xff]  }
  0x2d   :  { %260 = vmatpush1.bf16.msra.mxu0 %v407_v7  ;;  %301 = vmatpush1.bf16.msra.mxu1 %v408_v8  ;;  %v426_v20 = vld [vmem:[#allocation5 + $0x88] ss:$16 sps:$4 sm:$0xff]   ;;  %v427_v21 = vld [vmem:[#allocation5 + $0xa4] ss:$16 sps:$4 sm:$0xff]   ;;  %v429_v22 = vld [vmem:[#allocation5 + $0xac] ss:$16 sps:$4 sm:$0xff]  }
  0x2e   :  { %261 = vmatprep.subr.bf16.mxu0 %v409_v9  ;;  %302 = vmatprep.subr.bf16.mxu1 %v411_v10  ;;  %v431_v23 = vld [vmem:[#allocation5 + $0xa0] ss:$16 sps:$4 sm:$0xff]   ;;  %v432_v24 = vld [vmem:[#allocation5 + $0xa8] ss:$16 sps:$4 sm:$0xff]   ;;  %v433_v25 = vld [vmem:[#allocation5 + $0xc4] ss:$16 sps:$4 sm:$0xff]  }
  0x2f   :  { %v435_v26 = vld [vmem:[#allocation5 + $0xcc] ss:$16 sps:$4 sm:$0xff]   ;;  %v437_v27 = vld [vmem:[#allocation5 + $0xc0] ss:$16 sps:$4 sm:$0xff]   ;;  %v438_v28 = vld [vmem:[#allocation5 + $0xc8] ss:$16 sps:$4 sm:$0xff]  }
  0x30   :  { %v439_v29 = vld [vmem:[#allocation5 + $0xe4] ss:$16 sps:$4 sm:$0xff]   ;;  %v441_v30 = vld [vmem:[#allocation5 + $0xec] ss:$16 sps:$4 sm:$0xff]   ;;  %v443_v31 = vld [vmem:[#allocation5 + $0xe0] ss:$16 sps:$4 sm:$0xff]  }
  0x31   :  { %262 = vmatpush1.bf16.msra.mxu0 %v413_v11  ;;  %303 = vmatpush1.bf16.msra.mxu1 %v414_v12  ;;  %v444_v32 = vld [vmem:[#allocation5 + $0xe8] ss:$16 sps:$4 sm:$0xff]   ;;  %v42_v33 = vld [vmem:[#allocation2] sm:$0xf]  ;;  %v78_v35 = vshrl.u32 %v77_v34, 7  ;;  %s349_s12 = sshll.u32 %s522_s11, 4  ;;  %s350_s12 = int_to_ptr.vmem [resolvable:$true] %s349_s12 }
  0x32   :  { %263 = vmatprep.subr.bf16.mxu0 %v415_v13  ;;  %304 = vmatprep.subr.bf16.mxu1 %v417_v14  ;;  %v75_v38 = vld [vmem:[%s591_s2] sm:$0xf]  ;;  %s489_s2 = scalar_lea.vmem %s350_s12, 512  ;;  %p494_p3 = scmp.lt.s32.totalorder %s350_s12, %s350_s12 }
  0x33   :  { %v79_v36 = vsub.s32 0, %v78_v35  ;;  %v87_v37 = vsub.s32 2, %v78_v35  ;;  %v83_v39 = vsub.s32 1, %v78_v35  ;;  %v91_v40 = vsub.s32 3, %v78_v35  ;;  %p490_p2 = scmp.ne.s32.totalorder %s350_s12, %s489_s2  ;;  %p495_p4 = scmp.lt.s32.totalorder %s489_s2, %s489_s2 }
  0x35   :  { %264 = vmatpush1.bf16.msra.mxu0 %v419_v15  ;;  %305 = vmatpush1.bf16.msra.mxu1 %v420_v16  ;;  %v80_v41 = vrot.slane %v75_v38, %v79_v36  ;;  %v88_v42 = vrot.slane %v75_v38, %v87_v37  ;;  %v84_v43 = vrot.slane %v75_v38, %v83_v39  ;;  %p496_p5 = por %p495_p4, %p494_p3 }
  0x36   :  { %265 = vmatprep.subr.bf16.mxu0 %v421_v17  ;;  %306 = vmatprep.subr.bf16.mxu1 %v423_v18  ;;  %v92_v44 = vrot.slane %v75_v38, %v91_v40 }
  0x37   :  { %p497_p6 = pnand %p496_p5, %p490_p2 }
  0x39   :  { %266 = vmatpush1.bf16.msra.mxu0 %v425_v19  ;;  %307 = vmatpush1.bf16.msra.mxu1 %v426_v20 }
  0x3a   :  { %267 = vmatprep.subr.bf16.mxu0 %v427_v21  ;;  %308 = vmatprep.subr.bf16.mxu1 %v429_v22 }
  0x3d   :  { %268 = vmatpush1.bf16.msra.mxu0 %v431_v23  ;;  %309 = vmatpush1.bf16.msra.mxu1 %v432_v24 }
  0x3e   :  { %269 = vmatprep.subr.bf16.mxu0 %v433_v25  ;;  %310 = vmatprep.subr.bf16.mxu1 %v435_v26 }
  0x41   :  { %270 = vmatpush1.bf16.msra.mxu0 %v437_v27  ;;  %311 = vmatpush1.bf16.msra.mxu1 %v438_v28 }
  0x42   :  { %271 = vmatprep.subr.bf16.mxu0 %v439_v29  ;;  %312 = vmatprep.subr.bf16.mxu1 %v441_v30 }
  0x45   :  { %272 = vmatpush1.bf16.msra.mxu0 %v443_v31  ;;  %313 = vmatpush1.bf16.msra.mxu1 %v444_v32 }
  0x48   :  { %290 = vmatmul.mubr.bf16.vlgmr.msra.gmra.mrb[0].mxu0 %v42_v33  ;;  %331 = vmatmul.mubr.bf16.vlgmr.msra.gmra.mrb[0].mxu1 %v42_v33 }
 0x11b   :  { %v291_v45 = vpop.f32.mrb[0].mxu0  ;;  %v332_v46 = vpop.f32.mrb[0].mxu1 }
 0x11c   :  { %v292_v47 = vadd.f32 %v291_v45, %v80_v41  ;;  %v333_v48 = vadd.f32 %v332_v46, %v88_v42  ;;  %v293_v49 = vpop.f32.mrb[1].mxu0  ;;  %v334_v50 = vpop.f32.mrb[1].mxu1 }
 0x11d   :  { %v294_v51 = vadd.f32 %v293_v49, %v84_v43  ;;  %v335_v52 = vadd.f32 %v334_v50, %v92_v44  ;;  %v295_v53 = vpop.f32.mrb[2].mxu0  ;;  %v336_v54 = vpop.f32.mrb[2].mxu1 }
 0x11e   :  { %339 = vst [vmem:[#allocation7] sm:$0xff] %v292_v47  ;;  %341 = vst [vmem:[#allocation7 + $0x10] sm:$0xff] %v333_v48  ;;  %v296_v55 = vpop.f32.mrb[3].mxu0  ;;  %v337_v56 = vpop.f32.mrb[3].mxu1 }
 0x11f   :  { %340 = vst [vmem:[#allocation7 + $0x8] sm:$0xff] %v294_v51  ;;  %342 = vst [vmem:[#allocation7 + $0x18] sm:$0xff] %v335_v52 }
 0x120   :  { %500 = shalt.err (!%p497_p6)
}
 0x121   :  { %s501_s15 = scalar_lea.hbm %s592_s3, 512 }
 0x122   :  { %p502_p7 = scmp.ne.s32.totalorder %s592_s3, %s501_s15  ;;  %p505_p8 = scmp.lt.u32.totalorder %s501_s15, %s592_s3 }
 0x124   :  { %p507_p9 = pnand %p505_p8, %p502_p7 }
 0x126   :  { %510 = shalt.err (!%p507_p9)
}
 0x127   :  { %352 = dma.vmem_to_hbm [thread:$0]  %s350_s12, 512, %s592_s3, [#allocation4]  }
 0x128   :  { %515 = dma.done.wait [#allocation4], 512  }
 0x129   :  { %516 = vsyncadd [#allocation4], 4294966784 }
 0x12a   :  { %356 = vsyncpa [#allocation3], 1 }
 0x12b   :  { %357 = vsyncpa [#allocation6], 1 }
 0x12c   :  { %358 = vsyncpa [#allocation4], 1 }

</bundles_post_ra>
